<compile_context>
chip_gen: v5e
topology: v5e:2x2
jax: 0.10.0
libtpu: 0.0.40
codegen_flags: <defaults>
</compile_context>

<pallas_src>
import jax
import jax.numpy as jnp
from jax.experimental import pallas as pl
from jax.experimental.pallas import tpu as pltpu


# --------------------------------------------------------------------------- #
# Kernel
# --------------------------------------------------------------------------- #
def _lingen_kernel(w_ref, feats_ref, prev_ref, pg_ref, pc_ref, out_ref):
    # w_ref: scalar-prefetched (4,) f32 mixing weights in SMEM (already softmaxed).
    w0 = w_ref[0]
    w1 = w_ref[1]
    w2 = w_ref[2]
    w3 = w_ref[3]
    acc = (
        w0 * feats_ref[...].astype(jnp.float32)
        + w1 * prev_ref[...].astype(jnp.float32)
        + w2 * pg_ref[...].astype(jnp.float32)
        + w3 * pc_ref[...].astype(jnp.float32)
    )
    out_ref[...] = acc.astype(out_ref.dtype)


# --------------------------------------------------------------------------- #
# Hardware / tiling helpers
# --------------------------------------------------------------------------- #
def _tpu_vmem_capacity_bytes():
    """Physical per-core VMEM; conservative 64 MiB (v7x) if the query fails."""
    try:
        cap = int(getattr(pltpu.get_tpu_info(), "vmem_capacity_bytes", 0))
        if cap > 0:
            return cap
    except Exception:
        pass
    return 64 * 1024 * 1024


def _pick_lane_width(total):
    """Largest L in {4096..128} (multiple of 128) that divides total, else None."""
    for L in (4096, 2048, 1024, 512, 256, 128):
        if total % L == 0:
            return L
    return None


def _choose_tile(B, D, dtype, vmem_budget_bytes):
    """Pick (block_rows, block_cols): lane-dense, VMEM-budgeted, grid never (1,1)."""
    itemsize = jnp.dtype(dtype).itemsize
    sublane = max(8, 32 // itemsize)          # f32 -> 8, bf16 -> 16, int8 -> 32

    # Columns first (lane width drives unmasked stores + fewer col tiles).
    if D % 128 == 0:
        block_cols = min(D, 4096)
    elif D >= 128:
        block_cols = min((D // 128) * 128, 4096)   # cdiv grid, only edge tile masked
    else:
        block_cols = D                              # tiny unaligned D: full dim

    # Rows fill the remaining VMEM budget (4 in + 1 out, double-buffered ~ 10 bufs).
    tile_budget = max(1, vmem_budget_bytes // 10)
    max_rows = max(sublane, tile_budget // max(1, block_cols * itemsize))
    block_rows = B if max_rows >= B else max(sublane, (max_rows // sublane) * sublane)

    # Never collapse to a (1,1) grid on non-tiny arrays: keep both v7x TCs busy
    # and keep writeback overlapped with the next read.  Keep per-step tiles
    # >= 256 KiB (>= ~1.25 MiB total traffic/step) so step overhead stays <5%.
    array_bytes = B * D * itemsize
    if array_bytes >= (1 << 21):
        target_steps = 8
    elif array_bytes >= (1 << 19):
        target_steps = 2
    else:
        target_steps = 1
    min_tile_bytes = 256 * 1024

    def n_steps(br, bc):
        return pl.cdiv(B, br) * pl.cdiv(D, bc)

    while (n_steps(block_rows, block_cols) < target_steps
           and block_rows > sublane
           and (block_rows // 2) * block_cols * itemsize >= min_tile_bytes):
        block_rows = max(sublane, ((block_rows // 2) // sublane) * sublane)
    while (n_steps(block_rows, block_cols) < target_steps
           and block_cols > 128
           and block_rows * (block_cols // 2) * itemsize >= min_tile_bytes):
        block_cols = max(128, ((block_cols // 2) // 128) * 128)

    return block_rows, block_cols


def _jnp_forward(w, feats, prev_feats, proto_g, proto_c):
    acc = (w[0] * feats.astype(jnp.float32)
           + w[1] * prev_feats.astype(jnp.float32)
           + w[2] * proto_g.astype(jnp.float32)
           + w[3] * proto_c.astype(jnp.float32))
    return acc.astype(feats.dtype)


# --------------------------------------------------------------------------- #
# Public entry point
# --------------------------------------------------------------------------- #
def linear_generator_forward(w_param, feats, prev_feats, proto_g, proto_c, *,
                             block_rows=None, block_cols=None,
                             vmem_budget_bytes=None,
                             min_pallas_bytes=4 * 1024 * 1024,
                             force_pallas=False):
    """Pallas implementation of LinearGenerator.forward.

    w_param: (4,) raw (pre-softmax) parameter (matches nn.Parameter(torch.ones(4))).
    feats / prev_feats / proto_g / proto_c: identically shaped feature tensors.
    """
    assert feats.shape == prev_feats.shape == proto_g.shape == proto_c.shape
    assert feats.dtype == prev_feats.dtype == proto_g.dtype == proto_c.dtype
    orig_shape = feats.shape

    # Parameter glue: softmax over the 4 mixing logits (not the hot path).
    w = jax.nn.softmax(w_param.astype(jnp.float32), axis=0)

    itemsize = jnp.dtype(feats.dtype).itemsize
    total = int(feats.size)
    traffic_bytes = 5 * total * itemsize

    # Tiny problems: launch + single-step DMA overhead dominates; let XLA fuse.
    if (not force_pallas) and traffic_bytes < min_pallas_bytes:
        return _jnp_forward(w, feats, prev_feats, proto_g, proto_c)

    # --- lane-dense 2D layout (elementwise op -> free to re-tile) ------------
    L = _pick_lane_width(total)
    if L is not None:
        to2d = lambda x: x.reshape(total // L, L)
    elif feats.ndim == 2:
        to2d = lambda x: x
    else:
        last = orig_shape[-1] if feats.ndim >= 1 else 1
        to2d = lambda x: x.reshape(-1, last)
    f2, p2, g2, c2 = (to2d(x) for x in (feats, prev_feats, proto_g, proto_c))
    B, D = f2.shape

    # --- generation-aware VMEM budget / limit --------------------------------
    vmem_cap = _tpu_vmem_capacity_bytes()
    if vmem_budget_bytes is None:
        # ~24 MiB on v7x (64 MiB VMEM), ~48 MiB on v5e/v6e (128 MiB VMEM).
        vmem_budget_bytes = min(3 * vmem_cap // 8, 48 * 1024 * 1024)

    sublane = max(8, 32 // itemsize)
    auto_rows, auto_cols = _choose_tile(B, D, f2.dtype, vmem_budget_bytes)

    if block_rows is None:
        block_rows = auto_rows
    else:  # round user value to a sublane multiple (or full dim) -> valid BlockSpec
        block_rows = min(block_rows, B)
        if block_rows < B:
            r = max(sublane, ((block_rows + sublane - 1) // sublane) * sublane)
            block_rows = B if r >= B else r
    if block_cols is None:
        block_cols = auto_cols
    else:  # round user value to a 128 multiple (or full dim)
        block_cols = min(block_cols, D)
        if block_cols < D:
            c = max(128, ((block_cols + 127) // 128) * 128)
            block_cols = D if c >= D else c

    # Ragged B / D: cdiv grid; Pallas pads edge-tile reads and masks edge writes.
    grid = (pl.cdiv(B, block_rows), pl.cdiv(D, block_cols))

    # index_map receives grid indices + the scalar-prefetch ref (positional).
    feat_spec = pl.BlockSpec((block_rows, block_cols), lambda i, j, w_ref: (i, j))

    # Scoped VMEM: 4 inputs x2 buffers + 1 output x2 buffers, +25% headroom,
    # clamped to ~85% of physical VMEM (v7x only has 64 MiB per TensorCore).
    tile_elems = block_rows * block_cols
    footprint = tile_elems * (8 * itemsize + 2 * itemsize)
    vmem_limit = int(min(int(vmem_cap * 0.85),
                         max(32 * 1024 * 1024, footprint + footprint // 4)))

    cost = pl.CostEstimate(
        flops=7 * total,                      # 4 muls + 3 adds per element
        transcendentals=0,
        bytes_accessed=traffic_bytes,
    )

    out2d = pl.pallas_call(
        _lingen_kernel,
        out_shape=jax.ShapeDtypeStruct((B, D), f2.dtype),
        grid_spec=pltpu.PrefetchScalarGridSpec(
            num_scalar_prefetch=1,            # w -> SMEM before the grid runs
            grid=grid,
            in_specs=[feat_spec, feat_spec, feat_spec, feat_spec],
            out_specs=feat_spec,
        ),
        compiler_params=pltpu.CompilerParams(
            dimension_semantics=("parallel", "parallel"),
            vmem_limit_bytes=vmem_limit,
        ),
        cost_estimate=cost,
    )(w, f2, p2, g2, c2)

    return out2d.reshape(orig_shape)


# --------------------------------------------------------------------------- #
# Reference + self-test
# --------------------------------------------------------------------------- #
def _reference(w_param, feats, prev_feats, proto_g, proto_c):
    w = jax.nn.softmax(w_param.astype(jnp.float32), axis=0)
    return _jnp_forward(w, feats, prev_feats, proto_g, proto_c)


if __name__ == "__main__":
    # Deterministic parameter init, exactly as in the module: w = ones(4).
    w_param = jnp.ones((4,), dtype=jnp.float32)
    key = jax.random.PRNGKey(0)
    ks = jax.random.split(key, 16)

    def make(shape, dtype, idx):
        return [jax.random.normal(ks[idx + i], shape, dtype=dtype) for i in range(4)]

    # --- Case 1: small shape, lane-dense flatten (total % 128 == 0) ----------
    a1 = make((8, 96), jnp.float32, 0)                # flattens to (3, 256)
    out1 = jax.block_until_ready(
        linear_generator_forward(w_param, *a1, force_pallas=True))
    ref1 = _reference(w_param, *a1)
    assert out1.shape == (8, 96) and out1.dtype == jnp.float32
    assert jnp.allclose(out1, ref1, atol=1e-6, rtol=1e-6)

    # --- Case 2: mid-size, auto tiles -> multi-step pipelined grid -----------
    a2 = make((512, 1024), jnp.float32, 4)            # flattens to (128, 4096)
    out2 = jax.block_until_ready(linear_generator_forward(w_param, *a2))
    ref2 = _reference(w_param, *a2)
    assert jnp.allclose(out2, ref2, atol=1e-6, rtol=1e-6)

    # --- Case 3: explicit (unaligned) tile overrides get rounded -------------
    a3 = make((64, 512), jnp.float32, 8)
    out3 = jax.block_until_ready(
        linear_generator_forward(w_param, *a3, block_rows=50, block_cols=200,
                                 force_pallas=True))
    ref3 = _reference(w_param, *a3)
    assert jnp.allclose(out3, ref3, atol=1e-6, rtol=1e-6)

    # --- Case 4: total not 128-divisible -> 2D fallback path ------------------
    a4 = make((7, 33), jnp.float32, 12)
    out4 = jax.block_until_ready(
        linear_generator_forward(w_param, *a4, force_pallas=True))
    ref4 = _reference(w_param, *a4)
    assert jnp.allclose(out4, ref4, atol=1e-6, rtol=1e-6)

    # --- Case 5: bf16 features exercise the explicit output cast --------------
    fb = jax.random.normal(ks[15], (32, 384), dtype=jnp.bfloat16)
    out5 = jax.block_until_ready(
        linear_generator_forward(w_param, fb, fb, fb, fb, force_pallas=True))
    ref5 = _reference(w_param, fb, fb, fb, fb)
    assert out5.dtype == jnp.bfloat16
    assert jnp.allclose(out5.astype(jnp.float32), ref5.astype(jnp.float32),
                        atol=2e-2, rtol=2e-2)

    # --- Case 6: tiny problem takes the plain-jnp fast path -------------------
    a6 = make((4, 16), jnp.float32, 0)
    out6 = jax.block_until_ready(linear_generator_forward(w_param, *a6))
    assert jnp.allclose(out6, _reference(w_param, *a6), atol=1e-6, rtol=1e-6)

    print("KERNEL_OK")
</pallas_src>

<mosaic_0001>
module attributes {stable_mosaic.version = 11 : i64} {
  func.func @_lingen_kernel(%arg0: i32, %arg1: i32, %arg2: memref<4xf32, #tpu.memory_space<smem>>, %arg3: memref<3x256xf32, #tpu.memory_space<vmem>>, %arg4: memref<3x256xf32, #tpu.memory_space<vmem>>, %arg5: memref<3x256xf32, #tpu.memory_space<vmem>>, %arg6: memref<3x256xf32, #tpu.memory_space<vmem>>, %arg7: memref<3x256xf32, #tpu.memory_space<vmem>>) attributes {dimension_semantics = [#tpu.dimension_semantics<parallel>, #tpu.dimension_semantics<parallel>], iteration_bounds = array<i64: 1, 1>, scalar_prefetch = 1 : i64, scratch_operands = 0 : i64, tpu.core_type = #tpu.core_type<tc>, window_params = [{transform_indices = @transform_0, window_bounds = array<i64: 3, 256>}, {transform_indices = @transform_1, window_bounds = array<i64: 3, 256>}, {transform_indices = @transform_2, window_bounds = array<i64: 3, 256>}, {transform_indices = @transform_3, window_bounds = array<i64: 3, 256>}, {transform_indices = @transform_4, window_bounds = array<i64: 3, 256>}]} {
    %c0 = arith.constant 0 : index
    %0 = memref.load %arg2[%c0] : memref<4xf32, #tpu.memory_space<smem>>
    %c1 = arith.constant 1 : index
    %1 = memref.load %arg2[%c1] : memref<4xf32, #tpu.memory_space<smem>>
    %c2 = arith.constant 2 : index
    %2 = memref.load %arg2[%c2] : memref<4xf32, #tpu.memory_space<smem>>
    %c3 = arith.constant 3 : index
    %3 = memref.load %arg2[%c3] : memref<4xf32, #tpu.memory_space<smem>>
    %c0_0 = arith.constant 0 : index
    %c0_1 = arith.constant 0 : index
    %4 = vector.load %arg3[%c0_0, %c0_1] : memref<3x256xf32, #tpu.memory_space<vmem>>, vector<3x256xf32>
    %5 = vector.broadcast %0 : f32 to vector<3x256xf32>
    %6 = arith.mulf %5, %4 : vector<3x256xf32>
    %c0_2 = arith.constant 0 : index
    %c0_3 = arith.constant 0 : index
    %7 = vector.load %arg4[%c0_2, %c0_3] : memref<3x256xf32, #tpu.memory_space<vmem>>, vector<3x256xf32>
    %8 = vector.broadcast %1 : f32 to vector<3x256xf32>
    %9 = arith.mulf %8, %7 : vector<3x256xf32>
    %10 = arith.addf %6, %9 : vector<3x256xf32>
    %c0_4 = arith.constant 0 : index
    %c0_5 = arith.constant 0 : index
    %11 = vector.load %arg5[%c0_4, %c0_5] : memref<3x256xf32, #tpu.memory_space<vmem>>, vector<3x256xf32>
    %12 = vector.broadcast %2 : f32 to vector<3x256xf32>
    %13 = arith.mulf %12, %11 : vector<3x256xf32>
    %14 = arith.addf %10, %13 : vector<3x256xf32>
    %c0_6 = arith.constant 0 : index
    %c0_7 = arith.constant 0 : index
    %15 = vector.load %arg6[%c0_6, %c0_7] : memref<3x256xf32, #tpu.memory_space<vmem>>, vector<3x256xf32>
    %16 = vector.broadcast %3 : f32 to vector<3x256xf32>
    %17 = arith.mulf %16, %15 : vector<3x256xf32>
    %18 = arith.addf %14, %17 : vector<3x256xf32>
    %c0_8 = arith.constant 0 : index
    %c0_9 = arith.constant 0 : index
    %19 = vector.load %arg7[%c0_8, %c0_9] : memref<3x256xf32, #tpu.memory_space<vmem>>, vector<3x256xf32>
    tpu.vector_store %arg7[%c0_8, %c0_9], %18 {strides = array<i32>} : memref<3x256xf32, #tpu.memory_space<vmem>>, vector<3x256xf32>,
    return
  }
  func.func @transform_0(%arg0: i32, %arg1: i32, %arg2: memref<4xf32, #tpu.memory_space<smem>>) -> (i32, i32) {
    %c0_i32 = arith.constant 0 : i32
    return %arg0, %arg1 : i32, i32
  }
  func.func @transform_1(%arg0: i32, %arg1: i32, %arg2: memref<4xf32, #tpu.memory_space<smem>>) -> (i32, i32) {
    %c0_i32 = arith.constant 0 : i32
    return %arg0, %arg1 : i32, i32
  }
  func.func @transform_2(%arg0: i32, %arg1: i32, %arg2: memref<4xf32, #tpu.memory_space<smem>>) -> (i32, i32) {
    %c0_i32 = arith.constant 0 : i32
    return %arg0, %arg1 : i32, i32
  }
  func.func @transform_3(%arg0: i32, %arg1: i32, %arg2: memref<4xf32, #tpu.memory_space<smem>>) -> (i32, i32) {
    %c0_i32 = arith.constant 0 : i32
    return %arg0, %arg1 : i32, i32
  }
  func.func @transform_4(%arg0: i32, %arg1: i32, %arg2: memref<4xf32, #tpu.memory_space<smem>>) -> (i32, i32) {
    %c0_i32 = arith.constant 0 : i32
    return %arg0, %arg1 : i32, i32
  }
}

</mosaic_0001>

<bundles_post_ra>
// kernel: tpu_custom_call.1
= control target key start
LH: loop header
LB: loop body
LE: loop exit
PB: predicated region body
PF: predicated region fallthrough
CT: control target
= control target key end

     0   :  { %s272_s21 = smov [#allocation3]   ;;  %s326_s0 = inlined_call_operand.hbm [shape: f32[4], index: 0, kind: input, shape index: {}]   ;;  %s327_s1 = inlined_call_operand.hbm [shape: f32[3,256], index: 1, kind: input, shape index: {}]   ;;  %s328_s2 = inlined_call_operand.hbm [shape: f32[3,256], index: 2, kind: input, shape index: {}]   ;;  %s329_s3 = inlined_call_operand.hbm [shape: f32[3,256], index: 3, kind: input, shape index: {}]   ;;  %s330_s4 = inlined_call_operand.hbm [shape: f32[3,256], index: 4, kind: input, shape index: {}]   ;;  %s331_s5 = inlined_call_operand.hbm [shape: f32[3,256], index: 5, kind: output, shape index: {}]  }
   0x1   :  { %s11_s20 = sshll.u32 %s326_s0, 4  ;;  %s12_s20 = int_to_ptr.hbm [resolvable:$true] %s11_s20 }
   0x2   :  { %14 = dma.hbm_to_smem %s12_s20, 16, %s272_s21, [#allocation2] }
   0x3   :  { %262 = dma.done.wait [#allocation2], 16 }
   0x4   :  { %263 = vsyncadd [#allocation2], 4294967280 }
   0x5   :  { %17 = sfence }
   0x6   :  { %18 = vsyncpa [#allocation5], 0 }
   0x7   :  { %19 = vsyncpa [#allocation8], 0 }
   0x8   :  { %20 = vsyncpa [#allocation11], 0  ;;  %s38_s24 = sshll.u32 %s328_s2, 4  ;;  %s39_s24 = int_to_ptr.hbm [resolvable:$true] %s38_s24 }
   0x9   :  { %21 = vsyncpa [#allocation6], 0  ;;  %s273_s25 = smov [#allocation7]   ;;  %s27_s28 = sshll.u32 %s327_s1, 4  ;;  %s28_s28 = int_to_ptr.hbm [resolvable:$true] %s27_s28 }
   0xa   :  { %s40_s26 = sshll.u32 %s273_s25, 4  ;;  %s274_s29 = smov [#allocation4]   ;;  %s41_s26 = int_to_ptr.vmem [resolvable:$true] %s40_s26 }
   0xb   :  { %43 = dma.hbm_to_vmem [thread:$0]  %s39_s24, 128, %s41_s26, [#allocation8]  }
   0xc   :  { %s29_s30 = sshll.u32 %s274_s29, 4  ;;  %s49_s8 = sshll.u32 %s329_s3, 4  ;;  %s30_s30 = int_to_ptr.vmem [resolvable:$true] %s29_s30  ;;  %s50_s8 = int_to_ptr.hbm [resolvable:$true] %s49_s8 }
   0xd   :  { %32 = dma.hbm_to_vmem [thread:$0]  %s28_s28, 128, %s30_s30, [#allocation5]  }
   0xe   :  { %s60_s10 = sshll.u32 %s330_s4, 4  ;;  %s275_s11 = smov [#allocation9]   ;;  %s61_s10 = int_to_ptr.hbm [resolvable:$true] %s60_s10 }
   0xf   :  { %s51_s12 = sshll.u32 %s275_s11, 4  ;;  %s276_s1 = smov [#allocation10]   ;;  %s52_s12 = int_to_ptr.vmem [resolvable:$true] %s51_s12 }
  0x10   :  { %54 = dma.hbm_to_vmem [thread:$0]  %s50_s8, 128, %s52_s12, [#allocation8]  }
  0x11   :  { %s62_s13 = sshll.u32 %s276_s1, 4  ;;  %s63_s13 = int_to_ptr.vmem [resolvable:$true] %s62_s13 }
  0x12   :  { %65 = dma.hbm_to_vmem [thread:$0]  %s61_s10, 128, %s63_s13, [#allocation11]  }
  0x13   :  { %264 = dma.done.wait [#allocation5], 128  }
  0x14   :  { %265 = vsyncadd [#allocation5], 4294967168 }
  0x15   :  { %266 = dma.done.wait [#allocation8], 256  }
  0x16   :  { %267 = vsyncadd [#allocation8], 4294967040 }
  0x17   :  { %268 = dma.done.wait [#allocation11], 128  }
  0x18   :  { %269 = vsyncadd [#allocation11], 4294967168  ;;  %s82_s3 = sld [smem:[#allocation3]]  ;;  %v86_v0 = vld [vmem:[#allocation4] sm:$0x77]  ;;  %s277_s4 = smov [#allocation12]  }
  0x19   :  { %s121_s14 = sld [smem:[#allocation3 + $0x1]]  ;;  %v89_v2 = vld [vmem:[#allocation7] sm:$0x77]  ;;  %v93_v3 = vld [vmem:[#allocation9] sm:$0x77]  ;;  %s107_s17 = sshll.u32 %s277_s4, 4  ;;  %s108_s17 = int_to_ptr.vmem [resolvable:$true] %s107_s17 }
  0x1a   :  { %s122_s15 = sld [smem:[#allocation3 + $0x2]]  ;;  %v97_v6 = vld [vmem:[#allocation10] sm:$0x77]  ;;  %s109_s20 = sshll.u32 %s331_s5, 4  ;;  %s110_s20 = int_to_ptr.hbm [resolvable:$true] %s109_s20 }
  0x1b   :  { %s123_s16 = sld [smem:[#allocation3 + $0x3]] }
  0x1e   :  { %v87_v1 = vstv %s82_s3 }
  0x1f   :  { %v88_v4 = vmul.f32 %v87_v1, %v86_v0  ;;  %v90_v5 = vstv %s121_s14 }
  0x20   :  { %v91_v7 = vmul.f32 %v90_v5, %v89_v2  ;;  %v94_v8 = vstv %s122_s15 }
  0x21   :  { %v95_v9 = vmul.f32 %v94_v8, %v93_v3  ;;  %v98_v10 = vstv %s123_s16 }
  0x22   :  { %v92_v11 = vadd.f32 %v91_v7, %v88_v4  ;;  %v99_v12 = vmul.f32 %v98_v10, %v97_v6 }
  0x24   :  { %v96_v13 = vadd.f32 %v95_v9, %v92_v11 }
  0x26   :  { %v100_v14 = vadd.f32 %v99_v12, %v96_v13 }
  0x28   :  { %101 = vst [vmem:[#allocation12] sm:$0x77] %v100_v14 }
  0x29   :  { %112 = dma.vmem_to_hbm [thread:$0]  %s108_s17, 128, %s110_s20, [#allocation6]  }
  0x2a   :  { %270 = dma.done.wait [#allocation6], 128  }
  0x2b   :  { %271 = vsyncadd [#allocation6], 4294967168 }
  0x2c   :  { %117 = vsyncpa [#allocation5], 1 }
  0x2d   :  { %118 = vsyncpa [#allocation8], 1 }
  0x2e   :  { %119 = vsyncpa [#allocation11], 1 }
  0x2f   :  { %120 = vsyncpa [#allocation6], 1 }

</bundles_post_ra>
